<compile_context>
chip_gen: v7x
topology: tpu7x:2x2x1
jax: 0.10.0
libtpu: 0.0.40
codegen_flags: <defaults>
</compile_context>

<pallas_src>
import math

import jax
import jax.numpy as jnp
from jax.experimental import pallas as pl
from jax.experimental.pallas import tpu as pltpu

D = 5               # protdim == locdim == aadim
OUT = 3 * D         # 15 stacked output features (prot | loc | aa)
SDIM = 16           # stacked feature dim padded 15 -> 16 (sublane multiple)
NEG_SLOPE = 0.01    # nn.LeakyReLU default slope


def _leaky_relu(v):
    # Exactly LeakyReLU for slope in (0, 1); mul+max = 2 VALU ops (vs cmp+mul+sel).
    return jnp.maximum(v, NEG_SLOPE * v)


def _round_up(v, m):
    return -(-v // m) * m


def substitution_encoding_kernel(x_ref, p_ref, o_ref):
    # x_ref: [3, TB]     inputs, batch on lanes
    # p_ref: [16, 21]    packed params: [:, :16] = M2 (block-diag stacked fc2.weight),
    #                    [:, 16:19] = M1 (stacked fc1.weight), [:, 19] = b1, [:, 20] = b2
    # o_ref: [15, TB]    stacked encodings, batch on lanes (lane-dense stores)
    x = x_ref[...]
    m2 = p_ref[:, 0:SDIM]                       # [16, 16]
    b1 = p_ref[:, SDIM + 3:SDIM + 4]            # [16, 1]
    b2 = p_ref[:, SDIM + 4:SDIM + 5]            # [16, 1]

    # Stacked fc1 for all three encoders: each encoder input is a scalar, so
    # this is three rank-1 broadcast FMAs on the VPU (no degenerate K=3 matmul).
    h = b1 + p_ref[:, SDIM + 0:SDIM + 1] * x[0:1, :]
    h = h + p_ref[:, SDIM + 1:SDIM + 2] * x[1:2, :]
    h = h + p_ref[:, SDIM + 2:SDIM + 3] * x[2:3, :]          # [16, TB]
    h = _leaky_relu(h)

    # Stacked fc2: one block-diagonal [16,16] x [16,TB] matmul on the MXU
    # (HIGHEST precision = exact f32 multi-pass), freeing the VPU.
    y = jnp.dot(m2, h, preferred_element_type=jnp.float32,
                precision=jax.lax.Precision.HIGHEST) + b2     # [16, TB]
    y = _leaky_relu(y)

    # Drop the padding row and store lane-dense.
    o_ref[...] = y[:OUT, :].astype(o_ref.dtype)


def _block_diag3(blocks):
    """Block-diagonal stack of three small 2-D matrices (host-side, tiny)."""
    rows = sum(b.shape[0] for b in blocks)
    cols = sum(b.shape[1] for b in blocks)
    out = jnp.zeros((rows, cols), jnp.float32)
    r = c = 0
    for b in blocks:
        out = out.at[r:r + b.shape[0], c:c + b.shape[1]].set(b)
        r += b.shape[0]
        c += b.shape[1]
    return out


def _pack_params(params):
    """Stack the three encoders into block-diagonal form and pack everything
    into a single [16, 21] array (one constant-index, VMEM-resident input)."""
    fc1_w, fc1_b, fc2_w, fc2_b = params          # [3,D,1], [3,D], [3,D,D], [3,D]
    pad = SDIM - OUT                              # 1 padding row
    m1 = _block_diag3([fc1_w[0], fc1_w[1], fc1_w[2]])   # [15, 3]
    m2 = _block_diag3([fc2_w[0], fc2_w[1], fc2_w[2]])   # [15, 15]
    b1 = fc1_b.reshape(OUT, 1)
    b2 = fc2_b.reshape(OUT, 1)
    packed = jnp.concatenate([
        jnp.pad(m2, ((0, pad), (0, pad))),        # cols  0:16
        jnp.pad(m1, ((0, pad), (0, 0))),          # cols 16:19
        jnp.pad(b1, ((0, pad), (0, 0))),          # col     19
        jnp.pad(b2, ((0, pad), (0, 0))),          # col     20
    ], axis=1)
    return packed.astype(jnp.float32)             # [16, 21]


def substitution_encoding(x, params, *, tb=32768, transpose_output=True):
    """x: [B, 3, 1] float32, params in PyTorch orientation.
    Returns [B, 15] (PyTorch contract), or [15, B] batch-on-lanes when
    transpose_output=False (skips the only remaining XLA relayout pass)."""
    B = x.shape[0]

    # Large tiles (per-grid-step overhead ~0.35 us), but keep >= 2 grid steps
    # whenever possible so v7x megacore can shard the parallel batch axis,
    # cap at 64K lanes, floor at the 128-lane minimum.
    tb_eff = max(128, min(int(tb), 65536, _round_up(pl.cdiv(B, 2), 128)))
    grid = pl.cdiv(B, tb_eff)           # partial last block is masked; no padding

    # Input relayout (batch onto lanes) kept in XLA — see header NOTE.
    xT = x.reshape(B, 3).T.astype(jnp.float32)    # [3, B]
    packed = _pack_params(params)                 # [16, 21]

    # Double-buffered VMEM footprint per lane: 32 B in + 64 B out (+ h/y temps).
    vmem_limit = int(min(max(tb_eff * 320 + (8 << 20), 16 << 20), 100 << 20))

    cost = pl.CostEstimate(
        flops=(2 * OUT + 2 * OUT * D + 4 * OUT) * B,
        transcendentals=0,
        bytes_accessed=(3 + OUT) * 4 * B,
    )

    out = pl.pallas_call(
        substitution_encoding_kernel,
        out_shape=jax.ShapeDtypeStruct((OUT, B), jnp.float32),
        grid_spec=pltpu.PrefetchScalarGridSpec(
            num_scalar_prefetch=0,
            grid=(grid,),
            in_specs=[
                pl.BlockSpec((3, tb_eff), lambda i: (0, i)),        # x tile
                pl.BlockSpec((SDIM, SDIM + 5), lambda i: (0, 0)),   # packed params (resident)
            ],
            out_specs=pl.BlockSpec((OUT, tb_eff), lambda i: (0, i)),
        ),
        compiler_params=pltpu.CompilerParams(
            dimension_semantics=("parallel",),
            vmem_limit_bytes=vmem_limit),
        cost_estimate=cost,
    )(xT, packed)

    if not transpose_output:
        return out                      # [15, B], zero extra HBM passes
    # NOTE(perf): this transpose is the dominant remaining cost (see header).
    return out.T                        # [B, 15] — PyTorch module contract


def init_params(key):
    """Deterministic synthetic parameters in the PyTorch shapes:
    fc1.weight [D,1], fc1.bias [D], fc2.weight [D,D], fc2.bias [D],
    stacked over the 3 encoders (prot, loc, aa)."""
    k1, k2, k3, k4 = jax.random.split(key, 4)
    lim2 = 1.0 / math.sqrt(D)
    fc1_w = jax.random.uniform(k1, (3, D, 1), jnp.float32, -1.0, 1.0)
    fc1_b = jax.random.uniform(k2, (3, D), jnp.float32, -1.0, 1.0)
    fc2_w = jax.random.uniform(k3, (3, D, D), jnp.float32, -lim2, lim2)
    fc2_b = jax.random.uniform(k4, (3, D), jnp.float32, -lim2, lim2)
    return fc1_w, fc1_b, fc2_w, fc2_b


def reference(x, params):
    """Pure-JAX reference mirroring the PyTorch forward (PyTorch orientation:
    out = h @ W.T + b).  Uses exact f32 (fc1 as broadcast, fc2 at HIGHEST) so
    the comparison is not polluted by XLA's default bf16 matmul passes."""
    fc1_w, fc1_b, fc2_w, fc2_b = params
    x2d = x.reshape(x.shape[0], 3)
    outs = []
    for k in range(3):
        h = _leaky_relu(x2d[:, k:k + 1] * fc1_w[k][:, 0][None, :] + fc1_b[k][None, :])
        h = _leaky_relu(jnp.dot(h, fc2_w[k].T,
                                precision=jax.lax.Precision.HIGHEST)
                        + fc2_b[k][None, :])
        outs.append(h)
    return jnp.concatenate(outs, axis=1)


if __name__ == "__main__":
    key = jax.random.PRNGKey(0)
    pkey, xkey = jax.random.split(key)
    params = init_params(pkey)

    # Small test: B=200 is not a multiple of 128, exercising the masked partial
    # last block (tb auto-caps to 128 here -> a 2-step grid).
    B = 200
    x = jax.random.normal(xkey, (B, 3, 1), dtype=jnp.float32)

    out = substitution_encoding(x, params)
    out = jax.block_until_ready(out)

    ref = reference(x, params)
    assert out.shape == (B, OUT)
    assert jnp.allclose(out, ref, atol=1e-5, rtol=1e-5), "mismatch vs reference"

    print("KERNEL_OK")
</pallas_src>

<mosaic_0001>
module attributes {stable_mosaic.version = 11 : i64} {
  func.func @substitution_encoding_kernel(%arg0: i32, %arg1: memref<3x128xf32, #tpu.memory_space<vmem>>, %arg2: memref<16x21xf32, #tpu.memory_space<vmem>>, %arg3: memref<15x128xf32, #tpu.memory_space<vmem>>) attributes {dimension_semantics = [#tpu.dimension_semantics<parallel>], iteration_bounds = array<i64: 2>, scalar_prefetch = 0 : i64, scratch_operands = 0 : i64, tpu.core_type = #tpu.core_type<tc>, window_params = [{transform_indices = @transform_0, window_bounds = array<i64: 3, 128>}, {pipeline_mode = #tpu.pipeline_mode<synchronous>, transform_indices = @transform_1, window_bounds = array<i64: 16, 21>}, {transform_indices = @transform_2, window_bounds = array<i64: 15, 128>}]} {
    %c0 = arith.constant 0 : index
    %c0_0 = arith.constant 0 : index
    %0 = vector.load %arg1[%c0, %c0_0] : memref<3x128xf32, #tpu.memory_space<vmem>>, vector<3x128xf32>
    %c0_1 = arith.constant 0 : index
    %c0_2 = arith.constant 0 : index
    %1 = vector.load %arg2[%c0_1, %c0_2] : memref<16x21xf32, #tpu.memory_space<vmem>>, vector<16x16xf32>
    %c0_3 = arith.constant 0 : index
    %c19 = arith.constant 19 : index
    %2 = vector.load %arg2[%c0_3, %c19] : memref<16x21xf32, #tpu.memory_space<vmem>>, vector<16x1xf32>
    %c0_4 = arith.constant 0 : index
    %c20 = arith.constant 20 : index
    %3 = vector.load %arg2[%c0_4, %c20] : memref<16x21xf32, #tpu.memory_space<vmem>>, vector<16x1xf32>
    %c0_5 = arith.constant 0 : index
    %c16 = arith.constant 16 : index
    %4 = vector.load %arg2[%c0_5, %c16] : memref<16x21xf32, #tpu.memory_space<vmem>>, vector<16x1xf32>
    %5 = vector.extract_strided_slice %0 {offsets = [0, 0], sizes = [1, 128], strides = [1, 1]} : vector<3x128xf32> to vector<1x128xf32>
    %6 = vector.broadcast %4 : vector<16x1xf32> to vector<16x128xf32>
    %7 = vector.broadcast %5 : vector<1x128xf32> to vector<16x128xf32>
    %8 = arith.mulf %6, %7 : vector<16x128xf32>
    %9 = vector.broadcast %2 : vector<16x1xf32> to vector<16x128xf32>
    %10 = arith.addf %9, %8 : vector<16x128xf32>
    %c0_6 = arith.constant 0 : index
    %c17 = arith.constant 17 : index
    %11 = vector.load %arg2[%c0_6, %c17] : memref<16x21xf32, #tpu.memory_space<vmem>>, vector<16x1xf32>
    %12 = vector.extract_strided_slice %0 {offsets = [1, 0], sizes = [1, 128], strides = [1, 1]} : vector<3x128xf32> to vector<1x128xf32>
    %13 = vector.broadcast %11 : vector<16x1xf32> to vector<16x128xf32>
    %14 = vector.broadcast %12 : vector<1x128xf32> to vector<16x128xf32>
    %15 = arith.mulf %13, %14 : vector<16x128xf32>
    %16 = arith.addf %10, %15 : vector<16x128xf32>
    %c0_7 = arith.constant 0 : index
    %c18 = arith.constant 18 : index
    %17 = vector.load %arg2[%c0_7, %c18] : memref<16x21xf32, #tpu.memory_space<vmem>>, vector<16x1xf32>
    %18 = vector.extract_strided_slice %0 {offsets = [2, 0], sizes = [1, 128], strides = [1, 1]} : vector<3x128xf32> to vector<1x128xf32>
    %19 = vector.broadcast %17 : vector<16x1xf32> to vector<16x128xf32>
    %20 = vector.broadcast %18 : vector<1x128xf32> to vector<16x128xf32>
    %21 = arith.mulf %19, %20 : vector<16x128xf32>
    %22 = arith.addf %16, %21 : vector<16x128xf32>
    %cst = arith.constant 0.00999999977 : f32
    %23 = vector.broadcast %cst : f32 to vector<16x128xf32>
    %24 = arith.mulf %23, %22 : vector<16x128xf32>
    %25 = arith.maximumf %22, %24 : vector<16x128xf32>
    %cst_8 = arith.constant dense<0.000000e+00> : vector<16x128xf32>
    %26 = tpu.matmul %1, %25, %cst_8 {dimension_numbers = #tpu.dot_dimension_numbers<[1], [0], [0], [1], [0, 0, 1, 1], [], []>, precision = #tpu.contract_precision<fp32>} : vector<16x16xf32>, vector<16x128xf32>, vector<16x128xf32> -> vector<16x128xf32>
    %27 = vector.broadcast %3 : vector<16x1xf32> to vector<16x128xf32>
    %28 = arith.addf %26, %27 : vector<16x128xf32>
    %cst_9 = arith.constant 0.00999999977 : f32
    %29 = vector.broadcast %cst_9 : f32 to vector<16x128xf32>
    %30 = arith.mulf %29, %28 : vector<16x128xf32>
    %31 = arith.maximumf %28, %30 : vector<16x128xf32>
    %32 = vector.extract_strided_slice %31 {offsets = [0, 0], sizes = [15, 128], strides = [1, 1]} : vector<16x128xf32> to vector<15x128xf32>
    %c0_10 = arith.constant 0 : index
    %c0_11 = arith.constant 0 : index
    %33 = vector.load %arg3[%c0_10, %c0_11] : memref<15x128xf32, #tpu.memory_space<vmem>>, vector<15x128xf32>
    tpu.vector_store %arg3[%c0_10, %c0_11], %32 {strides = array<i32>} : memref<15x128xf32, #tpu.memory_space<vmem>>, vector<15x128xf32>,
    return
  }
  func.func @transform_0(%arg0: i32) -> (i32, i32) {
    %c0_i32 = arith.constant 0 : i32
    %c0_i32_0 = arith.constant 0 : i32
    return %c0_i32, %arg0 : i32, i32
  }
  func.func @transform_1(%arg0: i32) -> (i32, i32) {
    %c0_i32 = arith.constant 0 : i32
    %c0_i32_0 = arith.constant 0 : i32
    %c0_i32_1 = arith.constant 0 : i32
    return %c0_i32, %c0_i32_0 : i32, i32
  }
  func.func @transform_2(%arg0: i32) -> (i32, i32) {
    %c0_i32 = arith.constant 0 : i32
    %c0_i32_0 = arith.constant 0 : i32
    return %c0_i32, %arg0 : i32, i32
  }
}

</mosaic_0001>

<bundles_post_ra>
// kernel: tpu_custom_call.1
= control target key start
LH: loop header
LB: loop body
LE: loop exit
PB: predicated region body
PF: predicated region fallthrough
CT: control target
= control target key end

     0   :  { %7 = vsyncpa [#allocation3], 0  ;;  %s1418_s0 = inlined_call_operand.hbm [shape: f32[3,200], index: 0, kind: input, shape index: {}]   ;;  %s1419_s1 = inlined_call_operand.hbm [shape: f32[16,21], index: 1, kind: input, shape index: {}]   ;;  %s1420_s2 = inlined_call_operand.hbm [shape: f32[15,200], index: 2, kind: output, shape index: {}]  }
   0x1   :  { %9 = vsyncpa [#allocation3 + $0x1], 0 }
   0x2   :  { %10 = vsyncpa [#allocation6], 0 }
   0x3   :  { %11 = vsyncpa [#allocation4], 0 }
   0x4   :  { %13 = vsyncpa [#allocation4 + $0x1], 0  ;;  %s1205_s9 = smov 0   ;;  %s1207_s10 = smov 0  }
   0x5   :  { %s1209_s11 = smov 0   ;;  %s1211_s12 = smov 0  }
   0x6 LB: > { %s1226_s13 = sadd.s32 4294967295, %s1175_s12   ;;  %s856_s14 = sadd.s32 4294967294, %s1175_s12   ;;  %s1175_s12 = sphi %s1211_s12, %s1440_s12   ;;  %s1171_s11 = sphi %s1209_s11, %s1439_s11   ;;  %s1167_s10 = sphi %s1207_s10, %s1438_s10   ;;  %s1163_s9 = sphi %s1205_s9, %s1437_s9  }
   0x7   : > { %p39_p0 = scmp.ne.s32.totalorder %s1167_s10, %s1163_s9  ;;  %p1421_p1 = scmp.eq.s32.totalorder %s1226_s13, 0 }
   0x8   : > { %p90_p3 = scmp.eq.s32.totalorder %s856_s14, 1  ;;  %p857_p5 = scmp.ge.s32.totalorder %s1175_s12, 1 }
   0x9   : > { %p1235_p4 = por %p1421_p1, %p39_p0  ;;  %p97_p7 = scmp.lt.s32.totalorder %s1175_s12, 3 }
   0xa   : > { %p1240_p6 = por %p90_p3, %p39_p0  ;;  %s1177_s18 = smov [#allocation5]  }
   0xb   : > { %s1424_s15 = scalar_select %p1235_p4, 1, 0 }
   0xc   : > { %s1425_s16 = scalar_select %p1240_p6, 1, 0 }
   0xd   : > { %p1245_p8 = pnand %p857_p5, %p97_p7  ;;  %s109_s19 = sshll.u32 %s1177_s18, 4  ;;  %s1249_s19 = int_to_ptr.vmem [resolvable:$true] %s109_s19 }
   0xe   : > { %s1261_s21 = sadd.s32 1, %s1175_s12   ;;  %s26_s22 = sadd.s32 1, %s1171_s11 }
   0xf   : > { %s1426_s17 = scalar_select %p1245_p8, 1, 0 }
  0x10   : > { %p980_p9 = pneg %p1245_p8  ;;  %s23_s23 = ssub.s32 %s1175_s12, %s1261_s21 }
  0x11   : > { %s1047_s26 = scalar_lea.hbm %s1419_s1, 256 }
  0x12   : > { %p1256_p11 = pnand %p980_p9, %p1421_p1  ;;  %p1048_p12 = scmp.ne.s32.totalorder %s1419_s1, %s1047_s26 }
  0x13   : > { %p1054_p5 = scmp.lt.u32.totalorder %s1047_s26, %s1419_s1 }
  0x14   : > { %p1049_p13 = pneg %p1256_p11 }
  0x16   : > { %p1050_p0 = pnand %p1049_p13, %p1048_p12 }
  0x18   : > { %p1051_p3 = pneg %p1050_p0 }
  0x1a   : > { %p1056_p7 = pnand %p1054_p5, %p1051_p3 }
  0x1c   : > { %1059 = shalt.err (!%p1056_p7)
}
  0x1d   : > { %s1060_s3 = scalar_lea.vmem %s1249_s19, 256  ;;  %p1068_p2 = scmp.lt.s32.totalorder %s1249_s19, %s1249_s19 }
  0x1e   : > { %p1061_p9 = scmp.ne.s32.totalorder %s1249_s19, %s1060_s3  ;;  %p1069_p6 = scmp.lt.s32.totalorder %s1060_s3, %s1060_s3 }
  0x20   : > { %p1063_p10 = pnand %p1061_p9, %p1049_p13  ;;  %p1070_p4 = por %p1069_p6, %p1068_p2 }
  0x22   : > { %p1064_p1 = pneg %p1063_p10 }
  0x24   : > { %p1071_p8 = pnand %p1070_p4, %p1064_p1 }
  0x26   : > { %1074 = shalt.err (!%p1071_p8)
}
  0x27   : > { %s1178_s4 = smov 128   ;;  %s1179_s5 = smov 8  }
  0x28   : > { %983 = dma.hbm_to_vmem [thread:$0]  (!%p1256_p11), %s1419_s1, 256, %s1249_s19, [#allocation6], %s1178_s4, %s1178_s4, %s1179_s5  }
  0x29   : > { %p24_p2 = scmp.eq.s32.totalorder %s23_s23, 0  ;;  %p33_p1 = scmp.ne.s32.totalorder %s1171_s11, %s1167_s10 }
  0x2a   : > { %p34_p4 = scmp.eq.s32.totalorder %s1175_s12, 0  ;;  %p993_p6 = scmp.lt.s32.totalorder %s1175_s12, 2 }
  0x2b   : > { %s1292_s8 = scalar_select %p24_p2, %s1171_s11, %s26_s22  }
  0x2c   : > { %p35_p8 = por %p34_p4, %p33_p1  ;;  %p1428_p10 = scmp.eq.s32.totalorder %s1226_s13, 1 }
  0x2d   : > { %s123_s18 = sand.u32 1, %s1171_s11   ;;  %s861_s24 = sshll.u32 %s1175_s12, 6 }
  0x2e   : > { %p1296_p12 = por %p1428_p10, %p33_p1  ;;  %s860_s25 = sshll.u32 %s123_s18, 2 }
  0x2f   : > { %s1305_s27 = scalar_lea.hbm %s1418_s0, %s861_s24  ;;  %s127_s19 = scalar_lea.vmem [#allocation2], %s860_s25 }
  0x30   : > { %s134_s22 = sshll.u32 %s127_s19, 4  ;;  %p1307_p11 = pnand %p993_p6, %p35_p8  ;;  %s1311_s22 = int_to_ptr.vmem [resolvable:$true] %s134_s22 }
  0x31   : > { %s124_s28 = scalar_lea.sflag [#allocation3], %s123_s18  ;;  %s1075_s29 = scalar_lea.hbm %s1305_s27, 64 }
  0x32   : > { %p1076_p13 = scmp.ne.s32.totalorder %s1305_s27, %s1075_s29  ;;  %p1077_p0 = pneg %p1307_p11 }
  0x33   : > { %s1080_s4 = scalar_lea.hbm %s1418_s0, 128  ;;  %p1081_p7 = scmp.lt.u32.totalorder %s1305_s27, %s1418_s0 }
  0x34   : > { %p1078_p3 = pnand %p1077_p0, %p1076_p13  ;;  %p1082_p9 = scmp.lt.u32.totalorder %s1080_s4, %s1075_s29 }
  0x35   : > { %p1084_p1 = scmp.lt.u32.totalorder %s1075_s29, %s1305_s27 }
  0x36   : > { %p1079_p5 = pneg %p1078_p3  ;;  %p1083_p2 = por %p1082_p9, %p1081_p7 }
  0x38   : > { %p1085_p4 = por %p1084_p1, %p1083_p2 }
  0x3a   : > { %p1086_p6 = pnand %p1085_p4, %p1079_p5 }
  0x3c   : > { %1089 = shalt.err (!%p1086_p6)
}
  0x3d   : > { %s1090_s7 = scalar_lea.vmem %s1311_s22, 64  ;;  %s1180_s18 = smov [#allocation2]  }
  0x3e   : > { %p1091_p8 = scmp.ne.s32.totalorder %s1311_s22, %s1090_s7  ;;  %s1095_s24 = sshll.u32 %s1180_s18, 4  ;;  %s1096_s24 = int_to_ptr.vmem [resolvable:$false] %s1095_s24 }
  0x3f   : > { %s1097_s25 = scalar_lea.vmem %s1096_s24, 128  ;;  %p1098_p3 = scmp.lt.s32.totalorder %s1311_s22, %s1096_s24 }
  0x40   : > { %p1093_p10 = pnand %p1091_p8, %p1077_p0  ;;  %p1099_p7 = scmp.lt.s32.totalorder %s1097_s25, %s1090_s7 }
  0x42   : > { %p1094_p13 = pneg %p1093_p10  ;;  %p1100_p9 = por %p1099_p7, %p1098_p3 }
  0x44   : > { %p1101_p2 = pnand %p1100_p9, %p1094_p13 }
  0x46   : > { %1104 = shalt.err (!%p1101_p2)
}
  0x47   : > { %987 = dma.hbm_to_vmem [thread:$0]  (!%p1307_p11), %s1305_s27, 64, %s1311_s22, %s124_s28  }
  0x48   : > { %p1431_p5 = scmp.ne.s32.totalorder %s1426_s17, 0 }
  0x49   : > { %s1341_s20 = sand.u32 (!%p1431_p5), 1, %s1167_s10   ;;  %p1432_p0 = scmp.ne.s32.totalorder (!%p1431_p5), %s1424_s15, 0 }
  0x4a   : > { %143 = sbr.rel (%p1431_p5) target bundleno = 498 (0x1f2), region = 28  ;;  %s863_s26 = sshll.u32 (!%p1431_p5), %s1341_s20, 2 }
  0x4b   : > { %s146_s19 = scalar_lea.sflag (!%p1431_p5), [#allocation3], %s1341_s20  ;;  %s1345_s29 = scalar_lea.vmem (!%p1431_p5), [#allocation2], %s863_s26 }
  0x51   : > { %1150 = dma.done.wait (%p1432_p0), %s146_s19, 64  }
  0x52   : > { %1152 = vsyncadd (%p1432_p0), %s146_s19, 4294967232  ;;  %p1433_p11 = scmp.eq.s32.totalorder %s1226_s13, 0 }
  0x54   : > { %1154 = dma.done.wait (%p1433_p11), [#allocation6], 256   ;;  %p1434_p1 = pmov %p1433_p11 }
  0x55   : > { %v1181_v0 = vmov 19   ;;  %v1182_v1 = vmov 16   ;;  %v175_v2 = vld [vmem:[#allocation5] sm:$0xff]  ;;  %v176_v3 = vld [vmem:[#allocation5 + $0x8] sm:$0xff]  ;;  %v1183_v4 = vmov 17   ;;  %v1184_v5 = vmov 18  }
  0x56   : > { %1156 = vsyncadd (%p1434_p1), [#allocation6], 4294967040  ;;  %1040 = vset.pattern.permute.xlu1 %v1181_v0  ;;  %1039 = vset.pattern.permute.xlu0 %v1182_v1  ;;  %vm247_vm0 = vcmask 130048   ;;  %v1185_v13 = vmov 20   ;;  %v187_v14 = vlaneseq  ;;  %v174_v19 = vld [vmem:[%s1345_s29] sm:$0x7] }
  0x57   : > { %194 = vperm.xlu1 %1040, %v175_v2   ;;  %179 = vperm.xlu0 %1039, %v175_v2   ;;  %v248_v6 = vsel %vm247_vm0, %v175_v2, 0  ;;  %v250_v7 = vsel %vm247_vm0, %v176_v3, 0  ;;  %s865_s15 = sshll.u32 %s1341_s20, 4  ;;  %s867_s22 = sshll.u32 %s1226_s13, 7 }
  0x58   : > { %v1355_v8 = vand.u32 4294901760, %v248_v6  ;;  %v188_v15 = vshrl.u32 %v187_v14, 7  ;;  %v329_v30 = vand.u32 4294901760, %v250_v7  ;;  %s173_s17 = scalar_lea.vmem [#allocation7], %s865_s15  ;;  %s1374_s30 = scalar_lea.hbm %s1420_s2, %s867_s22 }
  0x59   : > { %s773_s27 = sshll.u32 %s173_s17, 4  ;;  %s761_s3 = scalar_lea.sflag [#allocation4], %s1341_s20  ;;  %s1369_s27 = int_to_ptr.vmem [resolvable:$true] %s773_s27 }
  0x5a   : > { %v1358_v9 = vsub.f32 %v248_v6, %v1355_v8  ;;  %v189_v18 = vsub.s32 0, %v188_v15  ;;  %v213_v20 = vsub.s32 1, %v188_v15  ;;  %v229_v25 = vsub.s32 2, %v188_v15  ;;  %s1105_s4 = scalar_lea.vmem %s1369_s27, 256  ;;  %s1186_s13 = smov [#allocation7]  }
  0x5b   : > { %198 = vperm.xlu1 %1040, %v176_v3   ;;  %184 = vperm.xlu0 %1039, %v176_v3   ;;  %v330_v38 = vsub.f32 %v250_v7, %v329_v30  ;;  %p1106_p4 = scmp.ne.s32.totalorder %s1369_s27, %s1105_s4  ;;  %s1109_s5 = sshll.u32 %s1186_s13, 4  ;;  %s1110_s5 = int_to_ptr.vmem [resolvable:$false] %s1109_s5 }
  0x5c   : > { %v321_v10 = vand.u32 4294901760, %v1358_v9  ;;  %v190_v23 = vrot.slane %v174_v19, %v189_v18  ;;  %v214_v24 = vrot.slane %v174_v19, %v213_v20  ;;  %v230_v33 = vrot.slane %v174_v19, %v229_v25  ;;  %s1111_s6 = scalar_lea.vmem %s1110_s5, 512  ;;  %p1112_p10 = scmp.lt.s32.totalorder %s1369_s27, %s1110_s5 }
  0x5d   : > { %v331_v47 = vand.u32 4294901760, %v330_v38  ;;  %p1107_p6 = pnand %p1106_p4, %p1296_p12  ;;  %p1113_p13 = scmp.lt.s32.totalorder %s1111_s6, %s1105_s4 }
  0x5e   : > { %v322_v11 = vsub.f32 %v1358_v9, %v321_v10  ;;  %919 = vmatprep.mubr.f32.mxu0 %v321_v10 }
  0x5f   : > { %1042 = vset.pattern.permute.xlu1 %v1183_v4  ;;  %1041 = vset.pattern.permute.xlu0 %v1183_v4  ;;  %v332_v52 = vsub.f32 %v330_v38, %v331_v47  ;;  %p1108_p8 = pneg %p1107_p6  ;;  %p1114_p3 = por %p1113_p13, %p1112_p10 }
  0x60   : > { %208 = vperm.xlu1 %1042, %v176_v3   ;;  %204 = vperm.xlu0 %1041, %v175_v2   ;;  %v323_v12 = vand.u32 4294901760, %v322_v11 }
  0x61   : > { %v333_v56 = vand.u32 4294901760, %v332_v52  ;;  %p1115_p7 = pnand %p1114_p3, %p1108_p8 }
  0x62   : > { %898 = vmatprep.mubr.f32.mxu1 %v323_v12 }
  0x64   : > { %1043 = vset.pattern.permute.xlu1 %v1184_v5  ;;  %1044 = vset.pattern.permute.xlu0 %v1184_v5 }
  0x65   : > { %220 = vperm.xlu1 %1043, %v175_v2   ;;  %224 = vperm.xlu0 %1044, %v176_v3  }
  0x69   : > { %1045 = vset.pattern.permute.xlu1 %v1185_v13  ;;  %1046 = vset.pattern.permute.xlu0 %v1185_v13 }
  0x6a   : > { %240 = vperm.xlu1 %1045, %v175_v2  }
  0x6e   : > { %244 = vperm.xlu1 %1045, %v176_v3  }
  0xd6   : > { %v195_v16 = vpop.permute.xlu1 %194  ;;  %v180_v17 = vpop.permute.xlu0 %179 }
  0xd7   : > { %v191_v26 = vmul.f32 %v190_v23, %v180_v17 }
  0xd9   : > { %v201_v34 = vadd.f32 %v195_v16, %v191_v26 }
  0xda   : > { %v199_v21 = vpop.permute.xlu1 %198  ;;  %v185_v22 = vpop.permute.xlu0 %184 }
  0xdb   : > { %v192_v27 = vmul.f32 %v190_v23, %v185_v22 }
  0xdd   : > { %v202_v35 = vadd.f32 %v199_v21, %v192_v27 }
  0xdf   : > { %v209_v28 = vpop.permute.xlu1 %208  ;;  %v205_v29 = vpop.permute.xlu0 %204 }
  0xe0   : > { %v216_v31 = vmul.f32 %v214_v24, %v209_v28  ;;  %v215_v32 = vmul.f32 %v214_v24, %v205_v29 }
  0xe2   : > { %v218_v39 = vadd.f32 %v216_v31, %v202_v35  ;;  %v217_v40 = vadd.f32 %v215_v32, %v201_v34 }
  0xe4   : > { %v221_v36 = vpop.permute.xlu1 %220  ;;  %v225_v37 = vpop.permute.xlu0 %224 }
  0xe5   : > { %v231_v41 = vmul.f32 %v230_v33, %v221_v36  ;;  %v232_v42 = vmul.f32 %v230_v33, %v225_v37 }
  0xe7   : > { %v233_v43 = vadd.f32 %v231_v41, %v217_v40  ;;  %v234_v44 = vadd.f32 %v232_v42, %v218_v39 }
  0xe9   : > { %v235_v45 = vmul.f32 0.01, %v233_v43  ;;  %v236_v46 = vmul.f32 0.01, %v234_v44  ;;  %v241_v2 = vpop.permute.xlu1 %240 }
  0xeb   : > { %v237_v48 = vmax.f32 %v233_v43, %v235_v45  ;;  %v238_v49 = vmax.f32 %v234_v44, %v236_v46 }
  0xed   : > { %v253_v50 = vand.u32 4294901760, %v237_v48  ;;  %v256_v51 = vand.u32 4294901760, %v238_v49  ;;  %v245_v3 = vpop.permute.xlu1 %244 }
  0xef   : > { %v341_v53 = vsub.f32 %v237_v48, %v253_v50  ;;  %v936_v54 = vpack.c.bf16 %v256_v51, %v253_v50  ;;  %v348_v55 = vsub.f32 %v238_v49, %v256_v51 }
  0xf1   : > { %937 = vmatprep.subr.bf16.mxu1 %v936_v54  ;;  %949 = vmatprep.subr.bf16.mxu0 %v936_v54  ;;  %v342_v57 = vand.u32 4294901760, %v341_v53  ;;  %v349_v58 = vand.u32 4294901760, %v348_v55  ;;  %v944_v1 = vpack.c.bf16 %v348_v55, %v341_v53 }
  0xf2   : > { %939 = vmatpush3.bf16.msra.mxu1 %v936_v54  ;;  %951 = vmatpush3.bf16.msra.mxu0 %v936_v54 }
  0xf3   : > { %v952_v59 = vpack.c.bf16 %v349_v58, %v342_v57  ;;  %v343_v60 = vsub.f32 %v341_v53, %v342_v57  ;;  %v350_v61 = vsub.f32 %v348_v55, %v349_v58 }
  0xf5   : > { %899 = vmatmul.mubr.f32.vlgmr.msra.gmra.mrb[0].mxu1 %v333_v56  ;;  %920 = vmatmul.mubr.f32.vlgmr.msra.gmra.mrb[0].mxu0 %v331_v47  ;;  %v344_v62 = vand.u32 4294901760, %v343_v60  ;;  %v351_v63 = vand.u32 4294901760, %v350_v61 }
  0xf6   : > { %953 = vmatprep.subr.bf16.mxu0 %v952_v59  ;;  %905 = vmatprep.mubr.f32.mxu1 %v1355_v8 }
  0xf7   : > { %955 = vmatpush3.bf16.msra.mxu0 %v952_v59  ;;  %v940_v0 = vpack.c.bf16 %v351_v63, %v344_v62  ;;  %926 = vmatprep.mubr.f32.mxu0 %v1355_v8 }
  0xf8   : > { %957 = vmatprep.subr.bf16.mxu0 %v936_v54 }
  0xf9   : > { %941 = vmatprep.subr.bf16.mxu1 %v940_v0 }
  0xfa   : > { %943 = vmatpush3.bf16.msra.mxu1 %v940_v0 }
  0xfb   : > { %945 = vmatprep.subr.bf16.mxu1 %v944_v1 }
  0xfd   : > { %906 = vmatmul.mubr.f32.vlgmr.msra.gmra.mrb[0].mxu1 %v329_v30  ;;  %927 = vmatmul.mubr.f32.vlgmr.msra.gmra.mrb[0].mxu0 %v329_v30 }
  0xfe   : > { %959 = vmatpush3.bf16.msra.mxu0 %v936_v54  ;;  %947 = vmatpush3.bf16.msra.mxu1 %v944_v1 }
  0xff   : > { %912 = vmatprep.mubr.f32.mxu1 %v1358_v9  ;;  %933 = vmatprep.mubr.f32.mxu0 %v1355_v8 }
 0x105   : > { %913 = vmatmul.mubr.f32.vlgmr.msra.gmra.mrb[0].mxu1 %v330_v38  ;;  %934 = vmatmul.mubr.f32.vlgmr.msra.gmra.mrb[0].mxu0 %v329_v30 }
 0x1d8   : > { %v914_v4 = vpop.f32.mrb[0].mxu1  ;;  %v935_v5 = vpop.f32.mrb[0].mxu0 }
 0x1d9   : > { %v960_v6 = vadd.f32 %v914_v4, %v245_v3  ;;  %v498_v7 = vpop.f32.mrb[1].mxu1  ;;  %v744_v10 = vpop.f32.mrb[1].mxu0 }
 0x1da   : > { %v962_v11 = vadd.f32 %v498_v7, %v241_v2 }
 0x1db   : > { %v961_v12 = vadd.f32 %v960_v6, %v935_v5 }
 0x1dc   : > { %v963_v9 = vadd.f32 %v962_v11, %v744_v10 }
 0x1dd   : > { %v755_v8 = vmul.f32 0.01, %v961_v12 }
 0x1de   : > { %v754_v13 = vmul.f32 0.01, %v963_v9 }
 0x1df   : > { %v757_v14 = vmax.f32 %v961_v12, %v755_v8 }
 0x1e0   : > { %v756_v15 = vmax.f32 %v963_v9, %v754_v13 }
 0x1e1   : > { %759 = vst [vmem:[%s173_s17 + $0x8] sm:$0x7f] %v757_v14 }
 0x1e2   : > { %758 = vst [vmem:[%s173_s17] sm:$0xff] %v756_v15 }
 0x1e3   : > { %1118 = shalt.err (!%p1115_p7)
}
 0x1e4   : > { %s1119_s7 = scalar_lea.hbm %s1374_s30, 256  ;;  %s1123_s25 = scalar_lea.hbm %s1420_s2, 512 }
 0x1e5   : > { %p1120_p9 = scmp.ne.s32.totalorder %s1374_s30, %s1119_s7  ;;  %p1124_p0 = scmp.lt.u32.totalorder %s1374_s30, %s1420_s2 }
 0x1e6   : > { %p1125_p11 = scmp.lt.u32.totalorder %s1123_s25, %s1119_s7  ;;  %p1127_p4 = scmp.lt.u32.totalorder %s1119_s7, %s1374_s30 }
 0x1e7   : > { %p1121_p2 = pnand %p1120_p9, %p1296_p12 }
 0x1e8   : > { %p1126_p1 = por %p1125_p11, %p1124_p0 }
 0x1e9   : > { %p1122_p5 = pneg %p1121_p2 }
 0x1ea   : > { %p1128_p6 = por %p1127_p4, %p1126_p1 }
 0x1ec   : > { %p1129_p8 = pnand %p1128_p6, %p1122_p5 }
 0x1ee   : > { %1132 = shalt.err (!%p1129_p8)
}
 0x1ef   : > { %s1187_s29 = smov 128   ;;  %s1188_s15 = smov 256  }
 0x1f0   : > { %s1189_s17 = smov 8  }
 0x1f1   : > { %978 = dma.vmem_to_hbm [thread:$0]  (%p1296_p12), %s1369_s27, 256, %s1374_s30, %s761_s3, %s1187_s29, %s1188_s15, %s1189_s17  }
 0x1f2 PF: > { %s788_s22 = sand.u32 1, %s1163_s9   ;;  %p1435_p10 = scmp.ne.s32.totalorder %s1425_s16, 0 }
 0x1f3   : > { %p1436_p13 = scmp.ge.s32.totalorder %s1175_s12, 2  ;;  %s789_s23 = scalar_lea.sflag [#allocation4], %s788_s22 }
 0x1f5   : > { %p989_p3 = pnand %p1436_p13, %p1435_p10 }
 0x1f7   : > { %1158 = dma.done.wait (!%p989_p3), %s789_s23, 256  }
 0x1f8   : > { %1160 = vsyncadd (!%p989_p3), %s789_s23, 4294967040  ;;  %p16_p7 = scmp.ge.s32.totalorder %s1261_s21, 4   ;;  %s1437_s9 = smov %s1167_s10 }
 0x1f9   : > { %s1438_s10 = smov %s1171_s11  ;;  %s1439_s11 = smov %s1292_s8 }
 0x1fa   : > { %s1440_s12 = smov %s1261_s21  ;;  %18 = sbr.rel (!%p16_p7) target bundleno = 6 (0x6), region = 77 }
 0x201   :  { %794 = vsyncpa [#allocation3], 1 }
 0x202   :  { %796 = vsyncpa [#allocation3 + $0x1], 1 }
 0x203   :  { %797 = vsyncpa [#allocation6], 1 }
 0x204   :  { %798 = vsyncpa [#allocation4], 1 }
 0x205   :  { %800 = vsyncpa [#allocation4 + $0x1], 1 }

</bundles_post_ra>
